<compile_context>
chip_gen: v6e
topology: v6e:2x2x1
jax: 0.10.0
libtpu: 0.0.40
codegen_flags: <defaults>
</compile_context>

<pallas_src>
import functools

import jax
import jax.numpy as jnp
from jax.experimental import pallas as pl
from jax.experimental.pallas import tpu as pltpu


def _round_up(x, m):
    return ((x + m - 1) // m) * m


def _pad2d(a, rows, cols, dtype):
    """Cast to dtype and zero-pad a 2-D array to (rows, cols); no-op copy if aligned."""
    a = a.astype(dtype)
    r, c = a.shape
    if r == rows and c == cols:
        return a
    return jnp.pad(a, ((0, rows - r), (0, cols - c)))


# --------------------------------------------------------------------------
# Pallas kernel: fused 2-layer MLP (Linear -> SiLU -> Linear), vocab-tiled.
# Grid: (M tiles, V tiles); the V axis is innermost/sequential and the hidden
# activation h is cached in VMEM scratch so the first matmul runs once per
# M-tile.
# --------------------------------------------------------------------------
def _mlp_kernel(x_ref, w1_ref, b1_ref, w2_ref, b2_ref, o_ref, h_ref):
    j = pl.program_id(1)

    @pl.when(j == 0)
    def _():
        h = jnp.dot(x_ref[...], w1_ref[...], preferred_element_type=jnp.float32)
        h = h + b1_ref[...]
        h = h * jax.nn.sigmoid(h)             # SiLU in f32
        h_ref[...] = h.astype(h_ref.dtype)    # cache as bf16 for the 2nd matmul

    o_ref[...] = (jnp.dot(h_ref[...], w2_ref[...],
                          preferred_element_type=jnp.float32) + b2_ref[...])


def mlp_pallas(x, w1, b1, w2, b2, *, tm=512, tn=1024):
    """x: (M, KD); w1: (KD, KD); b1: (1, KD); w2: (KD, V); b2: (1, V).

    Returns (M, V) float32 logits. Padding of M / KD / V and the bf16 cast of
    the matmul operands are handled internally.
    """
    M, KD = x.shape
    V = w2.shape[1]

    # Tile sizes: sublane multiple of 8, lane multiple of 128, clamped to shape.
    tm = max(8, min(_round_up(tm, 8), _round_up(M, 8)))
    tn = max(128, min(_round_up(tn, 128), _round_up(V, 128)))

    KDp = _round_up(KD, 128)   # lane-dense contraction dimension
    Mp = _round_up(M, tm)
    Vp = _round_up(V, tn)

    # Zero-pad and cast MXU operands to bf16 (f32 accumulation in-kernel).
    x_p = _pad2d(x, Mp, KDp, jnp.bfloat16)
    w1_p = _pad2d(w1, KDp, KDp, jnp.bfloat16)
    w2_p = _pad2d(w2, KDp, Vp, jnp.bfloat16)
    b1_p = _pad2d(b1, 1, KDp, jnp.float32)
    b2_p = _pad2d(b2, 1, Vp, jnp.float32)

    grid = (Mp // tm, Vp // tn)
    num_m_tiles = grid[0]

    # Advisory cost estimate for the XLA scheduler.
    flops = 2 * Mp * KDp * KDp + 2 * Mp * KDp * Vp
    bytes_accessed = int(
        Mp * KDp * 2                         # X (bf16), once per M tile
        + KDp * KDp * 2 + KDp * 4            # resident W1 / b1
        + KDp * Vp * 2 * num_m_tiles         # W2 streamed once per M tile
        + Vp * 4 * num_m_tiles               # b2 streamed once per M tile
        + Mp * Vp * 4)                       # output (f32)

    # VMEM budget: double-buffered tiles + resident weights + h scratch,
    # with margin; capped below v7x's 64 MiB physical VMEM.
    step_bytes = (2 * (tm * KDp * 2)       # x tile (bf16, double-buffered)
                  + 2 * (KDp * KDp * 2)    # W1
                  + 2 * (KDp * 4)          # b1
                  + 2 * (KDp * tn * 2)     # W2 vocab tile
                  + 2 * (tn * 4)           # b2 vocab tile
                  + 2 * (tm * tn * 4)      # output tile
                  + tm * KDp * 2)          # h scratch
    vmem_limit = int(min(60 * 1024 * 1024,
                         max(32 * 1024 * 1024, 2 * step_bytes + (4 << 20))))

    out = pl.pallas_call(
        _mlp_kernel,
        out_shape=jax.ShapeDtypeStruct((Mp, Vp), jnp.float32),
        grid_spec=pltpu.PrefetchScalarGridSpec(
            num_scalar_prefetch=0,
            grid=grid,
            in_specs=[
                pl.BlockSpec((tm, KDp), lambda i, j: (i, 0)),    # X tile
                pl.BlockSpec((KDp, KDp), lambda i, j: (0, 0)),   # W1 (resident)
                pl.BlockSpec((1, KDp), lambda i, j: (0, 0)),     # b1
                pl.BlockSpec((KDp, tn), lambda i, j: (0, j)),    # W2 vocab tile
                pl.BlockSpec((1, tn), lambda i, j: (0, j)),      # b2 vocab tile
            ],
            out_specs=pl.BlockSpec((tm, tn), lambda i, j: (i, j)),
            scratch_shapes=[pltpu.VMEM((tm, KDp), jnp.bfloat16)],  # cached h
        ),
        compiler_params=pltpu.CompilerParams(
            dimension_semantics=("parallel", "arbitrary"),
            vmem_limit_bytes=vmem_limit),
        cost_estimate=pl.CostEstimate(
            flops=flops, transcendentals=Mp * KDp, bytes_accessed=bytes_accessed),
    )(x_p, w1_p, b1_p, w2_p, b2_p)

    return out[:M, :V]


# --------------------------------------------------------------------------
# Full forward: context construction + embedding gather (plain JAX glue)
# followed by the Pallas MLP kernel.
# --------------------------------------------------------------------------
def kgram_embedding_seq_forward(tokens_seq, params, k, *, tm=512, tn=1024):
    """tokens_seq: (T, B) int32.  Returns (T, B, vocab) float32."""
    embed_table = params["embed"]              # (vocab, D), D = embed_size // k
    w1, b1 = params["w1"], params["b1"]        # (KD, KD), (1, KD)
    w2, b2 = params["w2"], params["b2"]        # (KD, V),  (1, V)

    T, B = tokens_seq.shape
    D = embed_table.shape[1]
    KD = k * D
    V = w2.shape[1]

    # Single gather of the zero-padded token stream in bf16 (MXU operand dtype);
    # build the k-gram with k static slices (avoids duplicating every embedding
    # row k times via a (T, k, B) fancy-index gather).
    padded = jnp.concatenate(
        [jnp.zeros((k, B), dtype=tokens_seq.dtype), tokens_seq], axis=0)   # (T+k, B)
    emb_all = embed_table.astype(jnp.bfloat16)[padded]                     # (T+k, B, D)
    ctx_emb = jnp.stack([emb_all[p:p + T] for p in range(k)], axis=1)      # (T, k, B, D)

    # Reproduce PyTorch's `embedded.view(batch_size, -1)` quirk exactly:
    # row-major reinterpretation of each (k, B, D) block as (B, k*D).
    x = ctx_emb.reshape(T * B, KD)

    # TODO(synk): the embedding gather itself could be fused into the Pallas
    # kernel (scalar-prefetched token ids + VMEM-resident embed table); it is
    # kept in plain JAX here because it is data-dependent indexing.
    logits = mlp_pallas(x, w1, b1, w2, b2, tm=tm, tn=tn)                   # (T*B, V)
    return logits.reshape(T, B, V)


# --------------------------------------------------------------------------
# Deterministic parameter construction (synthetic, matches module shapes)
# --------------------------------------------------------------------------
def init_params(key, vocab_size, k, embed_size):
    D = embed_size // k
    KD = D * k            # == self.embed_size in the module
    k_e, k_w1, k_b1, k_w2, k_b2 = jax.random.split(key, 5)
    return {
        "embed": jax.random.normal(k_e, (vocab_size, D), jnp.float32),
        # nn.Linear(KD, KD): weight (out,in); stored pre-transposed to (in,out)
        "w1": jax.random.normal(k_w1, (KD, KD), jnp.float32) * 0.05,
        "b1": jax.random.normal(k_b1, (1, KD), jnp.float32) * 0.05,
        # nn.Linear(KD, vocab): pre-transposed to (in, out)
        "w2": jax.random.normal(k_w2, (KD, vocab_size), jnp.float32) * 0.05,
        "b2": jax.random.normal(k_b2, (1, vocab_size), jnp.float32) * 0.05,
    }


if __name__ == "__main__":
    # Small shapes consistent with the module: k=3, embed_size=96 -> D=32, KD=96.
    # vocab=200 / seq=9 / batch=4 exercise the KD-, V- and M-padding paths and
    # (with tm=16, tn=128) a multi-tile grid including the h-caching j-loop.
    vocab_size = 200
    k = 3
    embed_size = 96
    seq_len = 9
    batch_size = 4

    key = jax.random.PRNGKey(0)
    key_tok, key_params = jax.random.split(key)

    tokens_seq = jax.random.randint(
        key_tok, (seq_len, batch_size), 0, vocab_size, dtype=jnp.int32)
    params = init_params(key_params, vocab_size, k, embed_size)

    fwd = jax.jit(functools.partial(
        kgram_embedding_seq_forward, k=k, tm=16, tn=128))
    out = jax.block_until_ready(fwd(tokens_seq, params))

    assert out.shape == (seq_len, batch_size, vocab_size), out.shape
    assert out.dtype == jnp.float32

    # Pure-JAX f32 reference of the per-timestep PyTorch loop.
    D = embed_size // k
    pad = jnp.concatenate(
        [jnp.zeros((k, batch_size), dtype=tokens_seq.dtype), tokens_seq], axis=0)
    ref_rows = []
    for t in range(seq_len):
        ctx = pad[t:t + k]                                    # (k, B)
        emb = params["embed"][ctx]                            # (k, B, D)
        xt = emb.reshape(batch_size, k * D)                   # row-major "view"
        h = xt @ params["w1"] + params["b1"]
        h = h * jax.nn.sigmoid(h)
        ref_rows.append(h @ params["w2"] + params["b2"])
    ref = jnp.stack(ref_rows, axis=0)                         # (T, B, V)

    # bf16 operands with f32 accumulation -> loosened tolerance vs f32 ref.
    max_err = float(jnp.max(jnp.abs(out - ref)))
    assert jnp.allclose(out, ref, atol=3e-2, rtol=3e-2), max_err

    print("KERNEL_OK")
</pallas_src>

<mosaic_0001>
module attributes {stable_mosaic.version = 11 : i64} {
  func.func @_mlp_kernel(%arg0: i32, %arg1: i32, %arg2: memref<16x128xbf16, #tpu.memory_space<vmem>>, %arg3: memref<128x128xbf16, #tpu.memory_space<vmem>>, %arg4: memref<1x128xf32, #tpu.memory_space<vmem>>, %arg5: memref<128x128xbf16, #tpu.memory_space<vmem>>, %arg6: memref<1x128xf32, #tpu.memory_space<vmem>>, %arg7: memref<16x128xf32, #tpu.memory_space<vmem>>, %arg8: memref<16x128xbf16, #tpu.memory_space<vmem>>) attributes {dimension_semantics = [#tpu.dimension_semantics<parallel>, #tpu.dimension_semantics<arbitrary>], iteration_bounds = array<i64: 3, 2>, scalar_prefetch = 0 : i64, scratch_operands = 1 : i64, tpu.core_type = #tpu.core_type<tc>, window_params = [{transform_indices = @transform_0, window_bounds = array<i64: 16, 128>}, {pipeline_mode = #tpu.pipeline_mode<synchronous>, transform_indices = @transform_1, window_bounds = array<i64: 128, 128>}, {pipeline_mode = #tpu.pipeline_mode<synchronous>, transform_indices = @transform_2, window_bounds = array<i64: 1, 128>}, {transform_indices = @transform_3, window_bounds = array<i64: 128, 128>}, {transform_indices = @transform_4, window_bounds = array<i64: 1, 128>}, {transform_indices = @transform_5, window_bounds = array<i64: 16, 128>}]} {
    %c0_i32 = arith.constant 0 : i32
    %0 = arith.cmpi eq, %arg1, %c0_i32 : i32
    %1 = arith.extui %0 : i1 to i32
    %c0_i32_0 = arith.constant 0 : i32
    %2 = arith.cmpi ne, %1, %c0_i32_0 : i32
    scf.if %2 {
      %c0_8 = arith.constant 0 : index
      %c0_9 = arith.constant 0 : index
      %10 = vector.load %arg2[%c0_8, %c0_9] : memref<16x128xbf16, #tpu.memory_space<vmem>>, vector<16x128xbf16>
      %c0_10 = arith.constant 0 : index
      %c0_11 = arith.constant 0 : index
      %11 = vector.load %arg3[%c0_10, %c0_11] : memref<128x128xbf16, #tpu.memory_space<vmem>>, vector<128x128xbf16>
      %cst_12 = arith.constant dense<0.000000e+00> : vector<16x128xf32>
      %12 = tpu.matmul %10, %11, %cst_12 {dimension_numbers = #tpu.dot_dimension_numbers<[1], [0], [0], [1], [0, 0, 1, 1], [], []>} : vector<16x128xbf16>, vector<128x128xbf16>, vector<16x128xf32> -> vector<16x128xf32>
      %c0_13 = arith.constant 0 : index
      %c0_14 = arith.constant 0 : index
      %13 = vector.load %arg4[%c0_13, %c0_14] : memref<1x128xf32, #tpu.memory_space<vmem>>, vector<1x128xf32>
      %14 = vector.broadcast %13 : vector<1x128xf32> to vector<16x128xf32>
      %15 = arith.addf %12, %14 : vector<16x128xf32>
      %16 = arith.negf %15 : vector<16x128xf32>
      %17 = math.exp %16 : vector<16x128xf32>
      %cst_15 = arith.constant 1.000000e+00 : f32
      %18 = vector.broadcast %cst_15 : f32 to vector<16x128xf32>
      %19 = arith.addf %18, %17 : vector<16x128xf32>
      %20 = arith.divf %18, %19 : vector<16x128xf32>
      %21 = arith.mulf %15, %20 : vector<16x128xf32>
      %22 = arith.truncf %21 : vector<16x128xf32> to vector<16x128xbf16>
      %c0_16 = arith.constant 0 : index
      %c0_17 = arith.constant 0 : index
      %23 = vector.load %arg8[%c0_16, %c0_17] : memref<16x128xbf16, #tpu.memory_space<vmem>>, vector<16x128xbf16>
      tpu.vector_store %arg8[%c0_16, %c0_17], %22 {strides = array<i32>} : memref<16x128xbf16, #tpu.memory_space<vmem>>, vector<16x128xbf16>,
    } else {
    }
    %c0 = arith.constant 0 : index
    %c0_1 = arith.constant 0 : index
    %3 = vector.load %arg8[%c0, %c0_1] : memref<16x128xbf16, #tpu.memory_space<vmem>>, vector<16x128xbf16>
    %c0_2 = arith.constant 0 : index
    %c0_3 = arith.constant 0 : index
    %4 = vector.load %arg5[%c0_2, %c0_3] : memref<128x128xbf16, #tpu.memory_space<vmem>>, vector<128x128xbf16>
    %cst = arith.constant dense<0.000000e+00> : vector<16x128xf32>
    %5 = tpu.matmul %3, %4, %cst {dimension_numbers = #tpu.dot_dimension_numbers<[1], [0], [0], [1], [0, 0, 1, 1], [], []>} : vector<16x128xbf16>, vector<128x128xbf16>, vector<16x128xf32> -> vector<16x128xf32>
    %c0_4 = arith.constant 0 : index
    %c0_5 = arith.constant 0 : index
    %6 = vector.load %arg6[%c0_4, %c0_5] : memref<1x128xf32, #tpu.memory_space<vmem>>, vector<1x128xf32>
    %7 = vector.broadcast %6 : vector<1x128xf32> to vector<16x128xf32>
    %8 = arith.addf %5, %7 : vector<16x128xf32>
    %c0_6 = arith.constant 0 : index
    %c0_7 = arith.constant 0 : index
    %9 = vector.load %arg7[%c0_6, %c0_7] : memref<16x128xf32, #tpu.memory_space<vmem>>, vector<16x128xf32>
    tpu.vector_store %arg7[%c0_6, %c0_7], %8 {strides = array<i32>} : memref<16x128xf32, #tpu.memory_space<vmem>>, vector<16x128xf32>,
    return
  }
  func.func @transform_0(%arg0: i32, %arg1: i32) -> (i32, i32) {
    %c0_i32 = arith.constant 0 : i32
    %c0_i32_0 = arith.constant 0 : i32
    return %arg0, %c0_i32 : i32, i32
  }
  func.func @transform_1(%arg0: i32, %arg1: i32) -> (i32, i32) {
    %c0_i32 = arith.constant 0 : i32
    %c0_i32_0 = arith.constant 0 : i32
    %c0_i32_1 = arith.constant 0 : i32
    return %c0_i32, %c0_i32_0 : i32, i32
  }
  func.func @transform_2(%arg0: i32, %arg1: i32) -> (i32, i32) {
    %c0_i32 = arith.constant 0 : i32
    %c0_i32_0 = arith.constant 0 : i32
    %c0_i32_1 = arith.constant 0 : i32
    return %c0_i32, %c0_i32_0 : i32, i32
  }
  func.func @transform_3(%arg0: i32, %arg1: i32) -> (i32, i32) {
    %c0_i32 = arith.constant 0 : i32
    %c0_i32_0 = arith.constant 0 : i32
    return %c0_i32, %arg1 : i32, i32
  }
  func.func @transform_4(%arg0: i32, %arg1: i32) -> (i32, i32) {
    %c0_i32 = arith.constant 0 : i32
    %c0_i32_0 = arith.constant 0 : i32
    return %c0_i32, %arg1 : i32, i32
  }
  func.func @transform_5(%arg0: i32, %arg1: i32) -> (i32, i32) {
    %c0_i32 = arith.constant 0 : i32
    return %arg0, %arg1 : i32, i32
  }
}

</mosaic_0001>

<bundles_post_ra>
// kernel: kgram_embedding_seq_forward.1
= control target key start
LH: loop header
LB: loop body
LE: loop exit
PB: predicated region body
PF: predicated region fallthrough
CT: control target
= control target key end

     0   :  { %s1300_s0 = inlined_call_operand.vmem [shape: bf16[48,128], index: 0, kind: input, shape index: {}]   ;;  %s1301_s1 = inlined_call_operand.vmem [shape: bf16[128,128], index: 1, kind: input, shape index: {}]   ;;  %s1302_s2 = inlined_call_operand.vmem [shape: f32[1,128], index: 2, kind: input, shape index: {}]   ;;  %s1303_s3 = inlined_call_operand.vmem [shape: bf16[128,256], index: 3, kind: input, shape index: {}]   ;;  %s1304_s4 = inlined_call_operand.vmem [shape: f32[1,256], index: 4, kind: input, shape index: {}]   ;;  %s1305_s5 = inlined_call_operand.vmem [shape: f32[48,256], index: 5, kind: output, shape index: {}]  }
   0x1   :  { %1307 = sst [smem:[#allocation6_spill]] %s1303_s3 }
   0x2   :  { %s1100_s18 = smov 0   ;;  %s1102_s19 = smov 0  }
   0x3   :  { %s1104_s20 = smov 0   ;;  %s1106_s21 = smov 0  }
   0x4   :  { %s1108_s22 = smov 0   ;;  %s1110_s23 = smov 0  }
   0x5   :  { %s1112_s24 = smov 0   ;;  %s1114_s25 = smov 0  }
   0x6   :  { %s1116_s26 = smov 0  }
   0x7 LB: > { %s784_s27 = sadd.s32 4294967295, %s1064_s26   ;;  %s24_s28 = sadd.s32 1, %s1056_s24  ;;  %s1064_s26 = sphi %s1116_s26, %s15_s26   ;;  %s1060_s25 = sphi %s1114_s25, %s1319_s25   ;;  %s1056_s24 = sphi %s1112_s24, %s1318_s24   ;;  %s1052_s23 = sphi %s1110_s23, %s1317_s23   ;;  %s1048_s22 = sphi %s1108_s22, %s1316_s22   ;;  %s1044_s21 = sphi %s1106_s21, %s1315_s21   ;;  %s1040_s20 = sphi %s1104_s20, %s1314_s20   ;;  %s1036_s19 = sphi %s1102_s19, %s1313_s19   ;;  %s1032_s18 = sphi %s1100_s18, %s1312_s18  }
   0x8   : > { %p25_p0 = scmp.ge.s32.totalorder %s24_s28, 2  ;;  %s27_s29 = sadd.s32 1, %s1060_s25 }
   0x9   : > { %s102_s30 = sadd.s32 1, %s1044_s21  ;;  %p109_p1 = scmp.ne.s32.totalorder %s1044_s21, %s1040_s20 }
   0xa   : > { %s1321_s28 = smov (%p25_p0, %s24_s28), 0  ;;  %s1323_s29 = smov (!%p25_p0, %s27_s29), %s1060_s25 }
   0xb   : > { %s99_s6 = ssub.s32 %s1056_s24, %s1321_s28  ;;  %p110_p2 = scmp.eq.s32.totalorder %s1064_s26, 0 }
   0xc   : > { %p29_p3 = scmp.ge.s32.totalorder %s1323_s29, 3  ;;  %p100_p4 = scmp.eq.s32.totalorder %s99_s6, 0 }
   0xd   : > { %p111_p5 = por %p110_p2, %p109_p1  ;;  %s156_s7 = sadd.s32 1, %s1036_s19 }
   0xe   : > { %s1325_s29 = smov (%p29_p3, %s1323_s29), 0  ;;  %p166_p6 = scmp.ne.s32.totalorder %s1036_s19, %s1032_s18 }
   0xf   : > { %1308 = sst [smem:[#allocation5_spill]] %s1325_s29  ;;  %s151_s9 = ssub.s32 %s1060_s25, %s1325_s29 }
  0x10   : > { %s1161_s8 = scalar_select %p100_p4, %s1044_s21, %s102_s30  }
  0x11   : > { %s153_s10 = sor.u32 %s151_s9, %s99_s6  ;;  %p167_p7 = scmp.eq.s32.totalorder %s784_s27, 5 }
  0x12   : > { %p154_p8 = scmp.eq.s32.totalorder %s153_s10, 0  ;;  %p787_p10 = scmp.ge.s32.totalorder %s1064_s26, 6 }
  0x13   : > { %p1167_p9 = por %p167_p7, %p166_p6 }
  0x14   : > { %s1172_s12 = scalar_select %p154_p8, %s1036_s19, %s156_s7  }
  0x15   : > { %195 = sbr.rel (%p787_p10) target bundleno = 46 (0x2e), region = 24 }
  0x1a   : > { %207 = sbr.rel (!%p111_p5) target bundleno = 46 (0x2e), region = 32  ;;  %s209_s13 = sand.u32 (%p111_p5), 1, %s1044_s21  }
  0x1b   : > { %s789_s14 = sshll.u32 (%p111_p5), %s1056_s24, 2  ;;  %s788_s15 = sshll.u32 (%p111_p5), %s209_s13, 6 }
  0x1c   : > { %s1310_s3 = sld [smem:[#allocation6_spill]] (%p111_p5)  ;;  %s211_s30 = scalar_lea.vmem (%p111_p5), [#allocation3], %s788_s15 }
  0x22   : > { %s1180_s27 = scalar_lea.vmem %s1310_s3, %s789_s14 }
  0x23   : > { %v230_v0 = vld [vmem:[%s1180_s27] sm:$0xf]  ;;  %v232_v1 = vld [vmem:[%s1180_s27 + $0x8] sm:$0xf]  ;;  %v234_v2 = vld [vmem:[%s1180_s27 + $0x10] sm:$0xf] }
  0x24   : > { %231 = vst [vmem:[%s211_s30] sm:$0xf] %v230_v0  ;;  %233 = vst [vmem:[%s211_s30 + $0x4] sm:$0xf] %v232_v1  ;;  %v236_v3 = vld [vmem:[%s1180_s27 + $0x18] sm:$0xf] }
  0x25   : > { %v238_v4 = vld [vmem:[%s1180_s27 + $0x20] sm:$0xf]  ;;  %235 = vst [vmem:[%s211_s30 + $0x8] sm:$0xf] %v234_v2  ;;  %237 = vst [vmem:[%s211_s30 + $0xc] sm:$0xf] %v236_v3 }
  0x26   : > { %239 = vst [vmem:[%s211_s30 + $0x10] sm:$0xf] %v238_v4  ;;  %v240_v5 = vld [vmem:[%s1180_s27 + $0x28] sm:$0xf]  ;;  %v242_v6 = vld [vmem:[%s1180_s27 + $0x30] sm:$0xf] }
  0x27   : > { %v244_v7 = vld [vmem:[%s1180_s27 + $0x38] sm:$0xf]  ;;  %241 = vst [vmem:[%s211_s30 + $0x14] sm:$0xf] %v240_v5  ;;  %243 = vst [vmem:[%s211_s30 + $0x18] sm:$0xf] %v242_v6 }
  0x28   : > { %245 = vst [vmem:[%s211_s30 + $0x1c] sm:$0xf] %v244_v7  ;;  %v246_v8 = vld [vmem:[%s1180_s27 + $0x40] sm:$0xf]  ;;  %v248_v9 = vld [vmem:[%s1180_s27 + $0x48] sm:$0xf] }
  0x29   : > { %v250_v10 = vld [vmem:[%s1180_s27 + $0x50] sm:$0xf]  ;;  %247 = vst [vmem:[%s211_s30 + $0x20] sm:$0xf] %v246_v8  ;;  %249 = vst [vmem:[%s211_s30 + $0x24] sm:$0xf] %v248_v9 }
  0x2a   : > { %251 = vst [vmem:[%s211_s30 + $0x28] sm:$0xf] %v250_v10  ;;  %v252_v11 = vld [vmem:[%s1180_s27 + $0x58] sm:$0xf]  ;;  %v254_v12 = vld [vmem:[%s1180_s27 + $0x60] sm:$0xf] }
  0x2b   : > { %v256_v13 = vld [vmem:[%s1180_s27 + $0x68] sm:$0xf]  ;;  %253 = vst [vmem:[%s211_s30 + $0x2c] sm:$0xf] %v252_v11  ;;  %255 = vst [vmem:[%s211_s30 + $0x30] sm:$0xf] %v254_v12 }
  0x2c   : > { %257 = vst [vmem:[%s211_s30 + $0x34] sm:$0xf] %v256_v13  ;;  %v258_v14 = vld [vmem:[%s1180_s27 + $0x70] sm:$0xf]  ;;  %v260_v15 = vld [vmem:[%s1180_s27 + $0x78] sm:$0xf] }
  0x2d   : > { %259 = vst [vmem:[%s211_s30 + $0x38] sm:$0xf] %v258_v14  ;;  %261 = vst [vmem:[%s211_s30 + $0x3c] sm:$0xf] %v260_v15 }
  0x2e PF: > { %p790_p11 = scmp.ge.s32.totalorder %s1064_s26, 1  ;;  %p322_p12 = scmp.lt.s32.totalorder %s1064_s26, 7 }
  0x30   : > { %p323_p13 = pnand %p790_p11, %p322_p12 }
  0x31   : > { %s329_s6 = sand.u32 (!%p323_p13), 1, %s1040_s20   ;;  %s360_s7 = sand.u32 (!%p323_p13), 1, %s1032_s18  }
  0x32   : > { %326 = sbr.rel (%p323_p13) target bundleno = 571 (0x23b), region = 77  ;;  %s791_s9 = sshll.u32 (!%p323_p13), %s329_s6, 6 }
  0x33   : > { %s792_s10 = sshll.u32 (!%p323_p13), %s360_s7, 4  ;;  %s793_s13 = sshll.u32 (!%p323_p13), %s1052_s23, 1 }
  0x34   : > { %p369_p0 = scmp.lt.s32.totalorder (!%p323_p13), %s1048_s22, 1  ;;  %p364_p1 = scmp.lt.s32.totalorder (!%p323_p13), %s793_s13, 5 }
  0x35   : > { %s1216_s18 = scalar_lea.vmem (!%p323_p13), [#allocation3], %s791_s9  ;;  %s1218_s20 = scalar_lea.vmem (!%p323_p13), [#allocation4], %s792_s10 }
  0x36   : > { %p795_p2 = scmp.ne.s32.totalorder (!%p323_p13), %s1048_s22, 0 }
  0x37   : > { %s1205_s14 = scalar_select %p369_p0, %s1048_s22, 1 }
  0x38   : > { %s1327_s13 = smov (!%p364_p1, %s793_s13), 5  ;;  %377 = sbr.rel (%p795_p2) target bundleno = 330 (0x14a), region = 85 }
  0x39   : > { %s371_s17 = scalar_lea.vmem %s1304_s4, %s1205_s14  ;;  %s794_s27 = sshll.u32 %s1327_s13, 2 }
  0x3a   : > { %s1214_s29 = scalar_lea.vmem %s1300_s0, %s794_s27 }
  0x3d   : > { %v968_v16 = vld [vmem:[%s1301_s1 + $0x38] sm:$0xff]   ;;  %v1066_v17 = vmov 0.0   ;;  %v969_v18 = vld [vmem:[%s1301_s1 + $0x30] sm:$0xff]   ;;  %vm1067_vm0 = vmmov 0   ;;  %v970_v19 = vld [vmem:[%s1301_s1 + $0x28] sm:$0xff]  }
  0x3e   : > { %852 = vmatprep.subr.bf16.mxu0 %v1066_v17  ;;  %868 = vmatprep.mubr.msk.bf16.mxu0 %vm1067_vm0, %v1066_v17  ;;  %v971_v20 = vld [vmem:[%s1301_s1 + $0x20] sm:$0xff]   ;;  %v972_v21 = vld [vmem:[%s1301_s1 + $0x18] sm:$0xff]   ;;  %v973_v22 = vld [vmem:[%s1301_s1 + $0x10] sm:$0xff]  }
  0x3f   : > { %853 = vmatpush3.bf16.msra.mxu0 %v968_v16  ;;  %v974_v23 = vld [vmem:[%s1301_s1 + $0x8] sm:$0xff]   ;;  %v975_v24 = vld [vmem:[%s1301_s1] sm:$0xff]  }
  0x40   : > { %854 = vmatprep.subr.bf16.mxu0 %v1066_v17  ;;  %v976_v25 = vld [vmem:[%s1214_s29] sm:$0xff]  }
  0x41   : > { %v796_v26 = vld [vmem:[%s1302_s2] ss:$0 sm:$0xff] }
  0x43   : > { %855 = vmatpush3.bf16.msra.mxu0 %v969_v18 }
  0x44   : > { %856 = vmatprep.subr.bf16.mxu0 %v1066_v17 }
  0x47   : > { %857 = vmatpush3.bf16.msra.mxu0 %v970_v19 }
  0x48   : > { %858 = vmatprep.subr.bf16.mxu0 %v1066_v17 }
  0x4b   : > { %859 = vmatpush3.bf16.msra.mxu0 %v971_v20 }
  0x4c   : > { %860 = vmatprep.subr.bf16.mxu0 %v1066_v17 }
  0x4f   : > { %861 = vmatpush3.bf16.msra.mxu0 %v972_v21 }
  0x50   : > { %862 = vmatprep.subr.bf16.mxu0 %v1066_v17 }
  0x53   : > { %863 = vmatpush3.bf16.msra.mxu0 %v973_v22 }
  0x54   : > { %864 = vmatprep.subr.bf16.mxu0 %v1066_v17 }
  0x57   : > { %865 = vmatpush3.bf16.msra.mxu0 %v974_v23 }
  0x58   : > { %866 = vmatprep.subr.bf16.mxu0 %v1066_v17 }
  0x5b   : > { %867 = vmatpush3.bf16.msra.mxu0 %v975_v24 }
  0x5e   : > { %869 = vmatmul.mubr.bf16.vlgmr.msra.gmra.mxu0 %v976_v25 }
 0x11e   : > { %v491_v27 = vpop.f32.mrf.mxu0 }
 0x11f   : > { %v492_v28 = vadd.f32 %v796_v26, %v491_v27 }
 0x120   : > { %v870_v29 = vpop.f32.mrf.mxu0 }
 0x121   : > { %v806_v30 = vmul.f32 -1.442695, %v492_v28 }
 0x122   : > { %v494_v31 = vpop.f32.mrf.mxu0 }
 0x123   : > { %977 = vpow2.f32 %v806_v30  ;;  %v495_v32 = vadd.f32 %v796_v26, %v494_v31 }
 0x124   : > { %v871_v33 = vpop.f32.mrf.mxu0 }
 0x125   : > { %v807_v34 = vmul.f32 -1.442695, %v495_v32 }
 0x127   : > { %979 = vpow2.f32 %v807_v34 }
 0x130   : > { %v978_v35 = vpop.eup %977 }
 0x131   : > { %v504_v36 = vadd.f32 1.0, %v978_v35 }
 0x133   : > { %981 = vrcp.f32 %v504_v36 }
 0x134   : > { %v980_v37 = vpop.eup %979 }
 0x135   : > { %v505_v38 = vadd.f32 1.0, %v980_v37 }
 0x137   : > { %983 = vrcp.f32 %v505_v38 }
 0x140   : > { %v982_v39 = vpop.eup %981 }
 0x141   : > { %v510_v41 = vmul.f32 %v982_v39, %v492_v28 }
 0x144   : > { %v984_v40 = vpop.eup %983 }
 0x145   : > { %v511_v42 = vmul.f32 %v984_v40, %v495_v32 }
 0x147   : > { %v832_v43 = vpack.c.bf16 %v511_v42, %v510_v41 }
 0x149   : > { %833 = vst [vmem:[#allocation2] sm:$0xff] %v832_v43  }
 0x14a PF: > { %v985_v44 = vld [vmem:[%s1216_s18 + $0x38] sm:$0xff]   ;;  %v1068_v45 = vmov 0.0   ;;  %v986_v46 = vld [vmem:[%s1216_s18 + $0x30] sm:$0xff]   ;;  %vm1069_vm1 = vmmov 0   ;;  %v987_v47 = vld [vmem:[%s1216_s18 + $0x28] sm:$0xff]  }
 0x14b   : > { %872 = vmatprep.subr.bf16.mxu0 %v1068_v45  ;;  %888 = vmatprep.mubr.msk.bf16.mxu0 %vm1069_vm1, %v1068_v45  ;;  %v988_v48 = vld [vmem:[%s1216_s18 + $0x20] sm:$0xff]   ;;  %v989_v49 = vld [vmem:[%s1216_s18 + $0x18] sm:$0xff]   ;;  %v990_v50 = vld [vmem:[%s1216_s18 + $0x10] sm:$0xff]  }
 0x14c   : > { %873 = vmatpush3.bf16.msra.mxu0 %v985_v44  ;;  %v991_v51 = vld [vmem:[%s1216_s18 + $0x8] sm:$0xff]   ;;  %v992_v52 = vld [vmem:[%s1216_s18] sm:$0xff]   ;;  %v810_v54 = vld [vmem:[%s371_s17] ss:$0 sm:$0xff]  ;;  %s828_s18 = sshll.u32 (%p1167_p9), %s1052_s23, 2 }
 0x14d   : > { %874 = vmatprep.subr.bf16.mxu0 %v1068_v45  ;;  %s653_s30 = sadd.s32 (%p1167_p9), %s1048_s22, %s828_s18 }
 0x14e   : > { %s823_s14 = sshll.u32 (%p1167_p9), %s653_s30, 3 }
 0x14f   : > { %s655_s7 = scalar_lea.vmem (%p1167_p9), %s1305_s5, %s823_s14 }
 0x150   : > { %875 = vmatpush3.bf16.msra.mxu0 %v986_v46  ;;  %v993_v53 = vld [vmem:[#allocation2] sm:$0xff]  }
 0x151   : > { %876 = vmatprep.subr.bf16.mxu0 %v1068_v45 }
 0x154   : > { %877 = vmatpush3.bf16.msra.mxu0 %v987_v47 }
 0x155   : > { %878 = vmatprep.subr.bf16.mxu0 %v1068_v45 }
 0x158   : > { %879 = vmatpush3.bf16.msra.mxu0 %v988_v48 }
 0x159   : > { %880 = vmatprep.subr.bf16.mxu0 %v1068_v45 }
 0x15c   : > { %881 = vmatpush3.bf16.msra.mxu0 %v989_v49 }
 0x15d   : > { %882 = vmatprep.subr.bf16.mxu0 %v1068_v45 }
 0x160   : > { %883 = vmatpush3.bf16.msra.mxu0 %v990_v50 }
 0x161   : > { %884 = vmatprep.subr.bf16.mxu0 %v1068_v45 }
 0x164   : > { %885 = vmatpush3.bf16.msra.mxu0 %v991_v51 }
 0x165   : > { %886 = vmatprep.subr.bf16.mxu0 %v1068_v45 }
 0x168   : > { %887 = vmatpush3.bf16.msra.mxu0 %v992_v52 }
 0x16b   : > { %889 = vmatmul.mubr.bf16.vlgmr.msra.gmra.mxu0 %v993_v53 }
 0x22b   : > { %v635_v55 = vpop.f32.mrf.mxu0 }
 0x22c   : > { %v636_v56 = vadd.f32 %v810_v54, %v635_v55 }
 0x22d   : > { %v890_v57 = vpop.f32.mrf.mxu0 }
 0x22e   : > { %642 = vst [vmem:[%s1218_s20] sm:$0xff] %v636_v56  ;;  %650 = sbr.rel (!%p1167_p9) target bundleno = 571 (0x23b), region = 89 }
 0x22f   : > { %v638_v58 = vpop.f32.mrf.mxu0 }
 0x230   : > { %v639_v59 = vadd.f32 %v810_v54, %v638_v58 }
 0x231   : > { %v891_v60 = vpop.f32.mrf.mxu0 }
 0x232   : > { %643 = vst [vmem:[%s1218_s20 + $0x8] sm:$0xff] %v639_v59 }
 0x235   : > { %v686_v61 = vld [vmem:[%s1218_s20] sm:$0xff] }
 0x236   : > { %687 = vst [vmem:[%s655_s7] sm:$0xff] %v686_v61 }
 0x239   : > { %v688_v62 = vld [vmem:[%s1218_s20 + $0x8] sm:$0xff] }
 0x23a   : > { %689 = vst [vmem:[%s655_s7 + $0x10] sm:$0xff] %v688_v62 }
 0x23b PF: > { %s15_s26 = sadd.s32 1, %s1064_s26   ;;  %s1311_s11 = sld [smem:[#allocation5_spill]] }
 0x23c   : > { %p12_p3 = scmp.ge.s32.totalorder %s15_s26, 8   ;;  %s1312_s18 = smov %s1036_s19 }
 0x23d   : > { %s1313_s19 = smov %s1172_s12  ;;  %s1314_s20 = smov %s1044_s21 }
 0x23e   : > { %s1315_s21 = smov %s1161_s8  ;;  %s1316_s22 = smov %s1056_s24 }
 0x23f   : > { %s1317_s23 = smov %s1060_s25  ;;  %s1318_s24 = smov %s1321_s28 }
 0x240   :  { %14 = sbr.rel (!%p12_p3) target bundleno = 7 (0x7), region = 164 }
 0x241   : > { %s1319_s25 = smov %s1311_s11 }

</bundles_post_ra>
